<compile_context>
chip_gen: v7x
topology: tpu7x:2x2x1
jax: 0.10.0
libtpu: 0.0.40
codegen_flags: <defaults>
</compile_context>

<pallas_src>
import numpy as np
import jax
import jax.numpy as jnp
from jax.experimental import pallas as pl
from jax.experimental.pallas import tpu as pltpu

IN_CH = 3
OUT_CH = 8
POOL = 28               # pooled spatial size
PAD = POOL + 2          # 30 = zero-padded map size for the 3x3 conv
K = 3                   # conv kernel size
TAP_ROWS = 32           # 28 tap rows padded to sublane-aligned 32
NFEAT = OUT_CH * POOL   # 224 = lane axis of the feature map


def simple_cnn_kernel(x_ref, bt_ref, lat_ref, cb_ref, fcwd_ref, fcbd_ref, out_ref):
    """One image per grid step. All matmul outputs are lane-dense (N = 96/224)."""
    x_cols = x_ref[0]                                                        # (m, C*n)

    # 1) All three horizontal conv taps of the (pool+pad) column operator in ONE
    #    matmul: Q[32*dj + w, c*n+a] = sum_b B_pad[b, w+dj] * x[c, a, b].
    q = jnp.dot(bt_ref[...], x_cols, preferred_element_type=jnp.float32)     # (96, C*n)

    # 2) Conv-as-GEMM with row-side pool/pad + Toeplitz weights pre-folded:
    #    feats[w, oc*28+h] = sum_dj sum_{c,a} Q[32*dj+w, c*n+a] * LA_dj^T[c*n+a, oc*28+h]
    feats = jnp.dot(q[0:TAP_ROWS], lat_ref[0], preferred_element_type=jnp.float32)
    feats = feats + jnp.dot(q[TAP_ROWS:2 * TAP_ROWS], lat_ref[1],
                            preferred_element_type=jnp.float32)
    feats = feats + jnp.dot(q[2 * TAP_ROWS:3 * TAP_ROWS], lat_ref[2],
                            preferred_element_type=jnp.float32)              # (32, 224)
    # bias + ReLU; rows 28..31 are dead (zeroed later by the zero FC rows).
    feats = jnp.maximum(feats + cb_ref[...], 0.0)

    # 3) Linear(6272->2) + 2-way softmax collapsed to sigmoid(w_diff.feats + b_diff).
    d = jnp.sum(fcwd_ref[...] * feats, keepdims=True) + fcbd_ref[...]        # (1, 1)
    out_ref[0] = 1.0 / (1.0 + jnp.exp(-d))                                   # cat prob


def adaptive_pool_matrix(in_size, out_size):
    """(out_size, in_size) averaging matrix matching nn.AdaptiveAvgPool2d bins."""
    P = np.zeros((out_size, in_size), np.float32)
    for i in range(out_size):
        start = (i * in_size) // out_size
        end = -((-(i + 1) * in_size) // out_size)  # ceil((i+1)*in/out)
        P[i, start:end] = 1.0 / (end - start)
    return jnp.asarray(P)


def nn_upsample_matrix(out_size, in_size):
    """Nearest-neighbor upsample selection matrix (out_size, in_size)."""
    M = np.zeros((out_size, in_size), np.float32)
    for i in range(out_size):
        M[i, (i * in_size) // out_size] = 1.0
    return jnp.asarray(M)


def _toeplitz_conv_weights(conv_w):
    """(K, 224, 90) with L[dj][oc*28+h, c*30+i] = conv_w[oc, c, i-h, dj] (else 0)."""
    h = np.arange(POOL)[None, :, None]
    i = np.arange(PAD)[None, None, :]
    di = np.arange(K)[:, None, None]
    pat = jnp.asarray((i == h + di).astype(np.float32))            # (K, 28, 30)
    L = jnp.einsum('ocdj,dhi->johci', conv_w, pat)                 # (K, 8, 28, 3, 30)
    return L.reshape(K, OUT_CH * POOL, IN_CH * PAD)


def make_simple_cnn_forward(R, Cmat, conv_w, conv_b, fc_w, fc_b):
    """Fold all static linear algebra into constants ONCE; return a jitted batched forward."""
    sub_n, n = R.shape
    m, sub_m = Cmat.shape
    ch = IN_CH
    chn = ch * n

    pr = adaptive_pool_matrix(sub_n, POOL)                 # (28, sub_n)
    pc = adaptive_pool_matrix(sub_m, POOL).T               # (sub_m, 28)
    A = pr @ R                                             # (28, n)   row-side operator
    Bm = Cmat @ pc                                         # (m, 28)   col-side operator
    A_pad = jnp.pad(A, ((1, 1), (0, 0)))                   # (30, n)   conv zero-pad folded in
    B_pad = jnp.pad(Bm, ((0, 0), (1, 1)))                  # (m, 30)

    # Block-diagonal row-side operator (per channel), folded into the conv weights.
    bd_a = jnp.zeros((ch * PAD, chn), jnp.float32)
    for c in range(ch):
        bd_a = bd_a.at[c * PAD:(c + 1) * PAD, c * n:(c + 1) * n].set(A_pad)

    l_taps = _toeplitz_conv_weights(conv_w)                            # (3, 224, 90)
    lat_taps = jnp.stack([(l_taps[dj] @ bd_a).T for dj in range(K)])   # (3, chn, 224)

    # Column-side taps stacked on 32-row blocks (sublane-aligned; rows 28..31 zero).
    bt_blocks = [jnp.pad(B_pad[:, dj:dj + POOL].T, ((0, TAP_ROWS - POOL), (0, 0)))
                 for dj in range(K)]
    bt_cat = jnp.concatenate(bt_blocks, axis=0)            # (96, m)

    cb_row = jnp.repeat(conv_b, POOL)[None, :]             # (1, 224) lane-dense conv bias

    # FC + softmax -> sigmoid of (class1 - class0) weights, re-laid out to match
    # feats[w, oc*28+h]; rows 28..31 zero so the dead feats rows contribute nothing.
    fcw_diff = (fc_w[1] - fc_w[0]).reshape(OUT_CH, POOL, POOL)         # (oc, h, w)
    fcwd = jnp.transpose(fcw_diff, (2, 0, 1)).reshape(POOL, NFEAT)     # (w, oc*28+h)
    fcwd_pad = jnp.pad(fcwd, ((0, TAP_ROWS - POOL), (0, 0)))           # (32, 224)
    fcbd = (fc_b[1] - fc_b[0]).reshape(1, 1)                           # (1, 1)

    @jax.jit
    def forward(x_batch):                                  # (B, C, n, m) -> (B,) cat probs
        bsz = x_batch.shape[0]
        x_cols = jnp.transpose(x_batch, (0, 3, 1, 2)).reshape(bsz, m, chn)
        out = pl.pallas_call(
            simple_cnn_kernel,
            out_shape=jax.ShapeDtypeStruct((bsz, 1, 1), jnp.float32),
            grid=(bsz,),
            in_specs=[
                pl.BlockSpec((1, m, chn), lambda i: (i, 0, 0)),        # per-image x
                pl.BlockSpec((K * TAP_ROWS, m), lambda i: (0, 0)),     # bt_cat (resident)
                pl.BlockSpec((K, chn, NFEAT), lambda i: (0, 0, 0)),    # lat_taps (resident)
                pl.BlockSpec((1, NFEAT), lambda i: (0, 0)),            # conv bias row
                pl.BlockSpec((TAP_ROWS, NFEAT), lambda i: (0, 0)),     # fc weight diff
                pl.BlockSpec((1, 1), lambda i: (0, 0)),                # fc bias diff
            ],
            out_specs=pl.BlockSpec((1, 1, 1), lambda i: (i, 0, 0)),
            compiler_params=pltpu.CompilerParams(
                dimension_semantics=("parallel",)),        # shard batch across TCs (v7x)
        )(x_cols, bt_cat, lat_taps, cb_row, fcwd_pad, fcbd)
        return out[:, 0, 0]

    return forward


def reference_forward(x, R, Cmat, conv_w, conv_b, fc_w, fc_b):
    """Pure-JAX reference mirroring the PyTorch module (single image)."""
    x_sub = jnp.einsum('ab,cbm->cam', R, x)
    x_sub = jnp.einsum('cam,mn->can', x_sub, Cmat)
    pr = adaptive_pool_matrix(x_sub.shape[1], POOL)
    pc = adaptive_pool_matrix(x_sub.shape[2], POOL).T
    pooled = jnp.einsum('pa,cab,bq->cpq', pr, x_sub, pc)
    y = jax.lax.conv_general_dilated(
        pooled[None], conv_w, (1, 1), 'SAME',
        dimension_numbers=('NCHW', 'OIHW', 'NCHW'))
    y = jax.nn.relu(y + conv_b[None, :, None, None])
    logits = y.reshape(1, -1) @ fc_w.T + fc_b
    probs = jax.nn.softmax(logits, axis=1)
    return probs[0, 1]


if __name__ == "__main__":
    B = 4               # batch of images processed per pallas_call
    n = m = 32          # input spatial size
    sub = 56            # nearest multiple of 28 >= 32

    key = jax.random.PRNGKey(0)
    kx, kcw, kcb, kfw, kfb = jax.random.split(key, 5)

    x = jax.random.normal(kx, (B, IN_CH, n, m), jnp.float32)
    R = nn_upsample_matrix(sub, n)        # (56, 32)
    Cmat = nn_upsample_matrix(sub, m).T   # (32, 56)

    conv_w = jax.random.normal(kcw, (OUT_CH, IN_CH, K, K), jnp.float32) * 0.1
    conv_b = jax.random.normal(kcb, (OUT_CH,), jnp.float32) * 0.1
    fc_w = jax.random.normal(kfw, (2, OUT_CH * POOL * POOL), jnp.float32) * 0.01
    fc_b = jax.random.normal(kfb, (2,), jnp.float32) * 0.1

    forward = make_simple_cnn_forward(R, Cmat, conv_w, conv_b, fc_w, fc_b)
    probs = jax.block_until_ready(forward(x))                           # (B,)

    ref = jnp.stack([reference_forward(x[b], R, Cmat, conv_w, conv_b, fc_w, fc_b)
                     for b in range(B)])
    ref = jax.block_until_ready(ref)

    err = float(jnp.max(jnp.abs(probs - ref)))
    assert err < 1e-3, (np.asarray(probs), np.asarray(ref), err)

    print("KERNEL_OK")
</pallas_src>

<mosaic_0001>
module attributes {stable_mosaic.version = 11 : i64} {
  func.func @simple_cnn_kernel(%arg0: i32, %arg1: memref<1x32x96xf32, #tpu.memory_space<vmem>>, %arg2: memref<96x32xf32, #tpu.memory_space<vmem>>, %arg3: memref<3x96x224xf32, #tpu.memory_space<vmem>>, %arg4: memref<1x224xf32, #tpu.memory_space<vmem>>, %arg5: memref<32x224xf32, #tpu.memory_space<vmem>>, %arg6: memref<1x1xf32, #tpu.memory_space<vmem>>, %arg7: memref<1x1x1xf32, #tpu.memory_space<vmem>>) attributes {dimension_semantics = [#tpu.dimension_semantics<parallel>], iteration_bounds = array<i64: 4>, scalar_prefetch = 0 : i64, scratch_operands = 0 : i64, tpu.core_type = #tpu.core_type<tc>, window_params = [{transform_indices = @transform_0, window_bounds = array<i64: 1, 32, 96>}, {pipeline_mode = #tpu.pipeline_mode<synchronous>, transform_indices = @transform_1, window_bounds = array<i64: 96, 32>}, {pipeline_mode = #tpu.pipeline_mode<synchronous>, transform_indices = @transform_2, window_bounds = array<i64: 3, 96, 224>}, {pipeline_mode = #tpu.pipeline_mode<synchronous>, transform_indices = @transform_3, window_bounds = array<i64: 1, 224>}, {pipeline_mode = #tpu.pipeline_mode<synchronous>, transform_indices = @transform_4, window_bounds = array<i64: 32, 224>}, {pipeline_mode = #tpu.pipeline_mode<synchronous>, transform_indices = @transform_5, window_bounds = array<i64: 1, 1>}, {transform_indices = @transform_6, window_bounds = array<i64: 1, 1, 1>}]} {
    %c0 = arith.constant 0 : index
    %c0_0 = arith.constant 0 : index
    %c0_1 = arith.constant 0 : index
    %0 = vector.load %arg1[%c0, %c0_0, %c0_1] : memref<1x32x96xf32, #tpu.memory_space<vmem>>, vector<1x32x96xf32>
    %1 = vector.shape_cast %0 : vector<1x32x96xf32> to vector<32x96xf32>
    %c0_2 = arith.constant 0 : index
    %c0_3 = arith.constant 0 : index
    %2 = vector.load %arg2[%c0_2, %c0_3] : memref<96x32xf32, #tpu.memory_space<vmem>>, vector<96x32xf32>
    %cst = arith.constant dense<0.000000e+00> : vector<96x96xf32>
    %3 = tpu.matmul %2, %1, %cst {dimension_numbers = #tpu.dot_dimension_numbers<[1], [0], [0], [1], [0, 0, 1, 1], [], []>} : vector<96x32xf32>, vector<32x96xf32>, vector<96x96xf32> -> vector<96x96xf32>
    %4 = vector.extract_strided_slice %3 {offsets = [0, 0], sizes = [32, 96], strides = [1, 1]} : vector<96x96xf32> to vector<32x96xf32>
    %c0_4 = arith.constant 0 : index
    %c0_5 = arith.constant 0 : index
    %c0_6 = arith.constant 0 : index
    %5 = vector.load %arg3[%c0_4, %c0_5, %c0_6] : memref<3x96x224xf32, #tpu.memory_space<vmem>>, vector<1x96x224xf32>
    %6 = vector.shape_cast %5 : vector<1x96x224xf32> to vector<96x224xf32>
    %cst_7 = arith.constant dense<0.000000e+00> : vector<32x224xf32>
    %7 = tpu.matmul %4, %6, %cst_7 {dimension_numbers = #tpu.dot_dimension_numbers<[1], [0], [0], [1], [0, 0, 1, 1], [], []>} : vector<32x96xf32>, vector<96x224xf32>, vector<32x224xf32> -> vector<32x224xf32>
    %8 = vector.extract_strided_slice %3 {offsets = [32, 0], sizes = [32, 96], strides = [1, 1]} : vector<96x96xf32> to vector<32x96xf32>
    %c1 = arith.constant 1 : index
    %c0_8 = arith.constant 0 : index
    %c0_9 = arith.constant 0 : index
    %9 = vector.load %arg3[%c1, %c0_8, %c0_9] : memref<3x96x224xf32, #tpu.memory_space<vmem>>, vector<1x96x224xf32>
    %10 = vector.shape_cast %9 : vector<1x96x224xf32> to vector<96x224xf32>
    %cst_10 = arith.constant dense<0.000000e+00> : vector<32x224xf32>
    %11 = tpu.matmul %8, %10, %cst_10 {dimension_numbers = #tpu.dot_dimension_numbers<[1], [0], [0], [1], [0, 0, 1, 1], [], []>} : vector<32x96xf32>, vector<96x224xf32>, vector<32x224xf32> -> vector<32x224xf32>
    %12 = arith.addf %7, %11 : vector<32x224xf32>
    %13 = vector.extract_strided_slice %3 {offsets = [64, 0], sizes = [32, 96], strides = [1, 1]} : vector<96x96xf32> to vector<32x96xf32>
    %c2 = arith.constant 2 : index
    %c0_11 = arith.constant 0 : index
    %c0_12 = arith.constant 0 : index
    %14 = vector.load %arg3[%c2, %c0_11, %c0_12] : memref<3x96x224xf32, #tpu.memory_space<vmem>>, vector<1x96x224xf32>
    %15 = vector.shape_cast %14 : vector<1x96x224xf32> to vector<96x224xf32>
    %cst_13 = arith.constant dense<0.000000e+00> : vector<32x224xf32>
    %16 = tpu.matmul %13, %15, %cst_13 {dimension_numbers = #tpu.dot_dimension_numbers<[1], [0], [0], [1], [0, 0, 1, 1], [], []>} : vector<32x96xf32>, vector<96x224xf32>, vector<32x224xf32> -> vector<32x224xf32>
    %17 = arith.addf %12, %16 : vector<32x224xf32>
    %c0_14 = arith.constant 0 : index
    %c0_15 = arith.constant 0 : index
    %18 = vector.load %arg4[%c0_14, %c0_15] : memref<1x224xf32, #tpu.memory_space<vmem>>, vector<1x224xf32>
    %19 = vector.broadcast %18 : vector<1x224xf32> to vector<32x224xf32>
    %20 = arith.addf %17, %19 : vector<32x224xf32>
    %cst_16 = arith.constant 0.000000e+00 : f32
    %21 = vector.broadcast %cst_16 : f32 to vector<32x224xf32>
    %22 = arith.maximumf %20, %21 : vector<32x224xf32>
    %c0_17 = arith.constant 0 : index
    %c0_18 = arith.constant 0 : index
    %23 = vector.load %arg5[%c0_17, %c0_18] : memref<32x224xf32, #tpu.memory_space<vmem>>, vector<32x224xf32>
    %24 = arith.mulf %23, %22 : vector<32x224xf32>
    %25 = vector.shape_cast %24 : vector<32x224xf32> to vector<1x32x224xf32>
    %cst_19 = arith.constant dense<0.000000e+00> : vector<1xf32>
    %26 = vector.multi_reduction <add>, %25, %cst_19 [1, 2] : vector<1x32x224xf32> to vector<1xf32>
    %27 = vector.shape_cast %26 : vector<1xf32> to vector<1x1x1xf32>
    %28 = vector.extract %27[0, 0, 0] : f32 from vector<1x1x1xf32>
    %29 = vector.broadcast %28 : f32 to vector<1x1xf32>
    %c0_20 = arith.constant 0 : index
    %c0_21 = arith.constant 0 : index
    %30 = vector.load %arg6[%c0_20, %c0_21] : memref<1x1xf32, #tpu.memory_space<vmem>>, vector<1x1xf32>
    %31 = arith.addf %29, %30 : vector<1x1xf32>
    %cst_22 = arith.constant 0.000000e+00 : f32
    %32 = vector.broadcast %cst_22 : f32 to vector<1x1xf32>
    %33 = arith.subf %32, %31 : vector<1x1xf32>
    %34 = math.exp %33 : vector<1x1xf32>
    %cst_23 = arith.constant 1.000000e+00 : f32
    %35 = vector.broadcast %cst_23 : f32 to vector<1x1xf32>
    %36 = arith.addf %35, %34 : vector<1x1xf32>
    %cst_24 = arith.constant 1.000000e+00 : f32
    %37 = vector.broadcast %cst_24 : f32 to vector<1x1xf32>
    %38 = arith.divf %37, %36 : vector<1x1xf32>
    %c0_25 = arith.constant 0 : index
    %c0_26 = arith.constant 0 : index
    %c0_27 = arith.constant 0 : index
    %39 = vector.load %arg7[%c0_25, %c0_26, %c0_27] : memref<1x1x1xf32, #tpu.memory_space<vmem>>, vector<1x1x1xf32>
    %40 = vector.shape_cast %39 : vector<1x1x1xf32> to vector<1x1xf32>
    %41 = vector.shape_cast %38 : vector<1x1xf32> to vector<1x1x1xf32>
    tpu.vector_store %arg7[%c0_25, %c0_26, %c0_27], %41 {strides = array<i32>} : memref<1x1x1xf32, #tpu.memory_space<vmem>>, vector<1x1x1xf32>,
    return
  }
  func.func @transform_0(%arg0: i32) -> (i32, i32, i32) {
    %c0_i32 = arith.constant 0 : i32
    %c0_i32_0 = arith.constant 0 : i32
    %c0_i32_1 = arith.constant 0 : i32
    return %arg0, %c0_i32, %c0_i32_0 : i32, i32, i32
  }
  func.func @transform_1(%arg0: i32) -> (i32, i32) {
    %c0_i32 = arith.constant 0 : i32
    %c0_i32_0 = arith.constant 0 : i32
    %c0_i32_1 = arith.constant 0 : i32
    return %c0_i32, %c0_i32_0 : i32, i32
  }
  func.func @transform_2(%arg0: i32) -> (i32, i32, i32) {
    %c0_i32 = arith.constant 0 : i32
    %c0_i32_0 = arith.constant 0 : i32
    %c0_i32_1 = arith.constant 0 : i32
    %c0_i32_2 = arith.constant 0 : i32
    return %c0_i32, %c0_i32_0, %c0_i32_1 : i32, i32, i32
  }
  func.func @transform_3(%arg0: i32) -> (i32, i32) {
    %c0_i32 = arith.constant 0 : i32
    %c0_i32_0 = arith.constant 0 : i32
    %c0_i32_1 = arith.constant 0 : i32
    return %c0_i32, %c0_i32_0 : i32, i32
  }
  func.func @transform_4(%arg0: i32) -> (i32, i32) {
    %c0_i32 = arith.constant 0 : i32
    %c0_i32_0 = arith.constant 0 : i32
    %c0_i32_1 = arith.constant 0 : i32
    return %c0_i32, %c0_i32_0 : i32, i32
  }
  func.func @transform_5(%arg0: i32) -> (i32, i32) {
    %c0_i32 = arith.constant 0 : i32
    %c0_i32_0 = arith.constant 0 : i32
    %c0_i32_1 = arith.constant 0 : i32
    return %c0_i32, %c0_i32_0 : i32, i32
  }
  func.func @transform_6(%arg0: i32) -> (i32, i32, i32) {
    %c0_i32 = arith.constant 0 : i32
    %c0_i32_0 = arith.constant 0 : i32
    %c0_i32_1 = arith.constant 0 : i32
    return %arg0, %c0_i32, %c0_i32_0 : i32, i32, i32
  }
}

</mosaic_0001>

<bundles_post_ra>
// kernel: forward.1
= control target key start
LH: loop header
LB: loop body
LE: loop exit
PB: predicated region body
PF: predicated region fallthrough
CT: control target
= control target key end

     0   :  { %s1422_s0 = inlined_call_operand.vmem [shape: f32[4,32,96], index: 0, kind: input, shape index: {}]   ;;  %s1423_s1 = inlined_call_operand.vmem [shape: f32[96,32], index: 1, kind: input, shape index: {}]   ;;  %s1424_s2 = inlined_call_operand.hbm [shape: f32[3,96,224], index: 2, kind: input, shape index: {}]   ;;  %s1425_s3 = inlined_call_operand.vmem [shape: f32[1,224], index: 3, kind: input, shape index: {}]   ;;  %s1426_s4 = inlined_call_operand.vmem [shape: f32[32,224], index: 4, kind: input, shape index: {}]   ;;  %s1427_s5 = inlined_call_operand.<no memory space> [shape: f32[1,1], index: 5, kind: input, shape index: {}]   ;;  %s1428_s6 = inlined_call_operand.vmem [shape: f32[4,1,1], index: 6, kind: output, shape index: {}]  }
   0x1   :  { %v11_v0 = vstv %s1427_s5 }
   0x2   :  { %12 = vst [vmem:[#allocation2] sm:$0x1] %v11_v0 }
   0x3   :  { %13 = vsyncpa [#allocation4], 0  ;;  %s1259_s23 = smov 0  }
   0x4 LB: > { %s1265_s24 = sadd.s32 4294967295, %s1215_s23   ;;  %p965_p0 = scmp.ge.s32.totalorder %s1215_s23, 1  ;;  %s1215_s23 = sphi %s1259_s23, %s19_s23  }
   0x5   : > { %p181_p1 = scmp.lt.s32.totalorder %s1215_s23, 5  ;;  %s1217_s25 = smov [#allocation3]  }
   0x6   : > { %s196_s5 = sshll.u32 %s1217_s25, 4  ;;  %p1429_p3 = scmp.eq.s32.totalorder %s1265_s24, 0  ;;  %s197_s5 = int_to_ptr.vmem [resolvable:$true] %s196_s5 }
   0x7   : > { %p1269_p2 = pnand %p965_p0, %p181_p1  ;;  %s1177_s30 = scalar_lea.hbm %s1424_s2, 9216 }
   0x8   : > { %p1178_p6 = scmp.ne.s32.totalorder %s1424_s2, %s1177_s30  ;;  %p1184_p10 = scmp.lt.u32.totalorder %s1177_s30, %s1424_s2 }
   0x9   : > { %s1431_s26 = scalar_select %p1269_p2, 1, 0 }
   0xa   : > { %p1155_p4 = pneg %p1269_p2 }
   0xc   : > { %p1278_p5 = pnand %p1429_p3, %p1155_p4 }
   0xe   : > { %p1179_p7 = pneg %p1278_p5 }
  0x10   : > { %p1180_p8 = pnand %p1179_p7, %p1178_p6 }
  0x12   : > { %p1181_p9 = pneg %p1180_p8 }
  0x14   : > { %p1186_p11 = pnand %p1184_p10, %p1181_p9 }
  0x16   : > { %1189 = shalt.err (!%p1186_p11)
}
  0x17   : > { %s1190_s11 = scalar_lea.vmem %s197_s5, 9216  ;;  %p1198_p1 = scmp.lt.s32.totalorder %s197_s5, %s197_s5 }
  0x18   : > { %p1191_p12 = scmp.ne.s32.totalorder %s197_s5, %s1190_s11  ;;  %p1199_p4 = scmp.lt.s32.totalorder %s1190_s11, %s1190_s11 }
  0x1a   : > { %p1193_p13 = pnand %p1191_p12, %p1179_p7  ;;  %p1200_p3 = por %p1199_p4, %p1198_p1 }
  0x1c   : > { %p1194_p0 = pneg %p1193_p13 }
  0x1e   : > { %p1201_p2 = pnand %p1200_p3, %p1194_p0 }
  0x20   : > { %1204 = shalt.err (!%p1201_p2)
}
  0x21   : > { %s1218_s12 = smov 256   ;;  %s1219_s13 = smov 16  }
  0x22   : > { %1158 = dma.hbm_to_vmem [thread:$0]  (!%p1278_p5), %s1424_s2, 9216, %s197_s5, [#allocation4], %s1218_s12, %s1218_s12, %s1219_s13  }
  0x23   : > { %p1433_p6 = scmp.ne.s32.totalorder %s1431_s26, 0 }
  0x24   : > { %p1434_p8 = scmp.eq.s32.totalorder (!%p1433_p6), %s1265_s24, 0 }
  0x25   : > { %229 = sbr.rel (%p1433_p6) target bundleno = 778 (0x30a), region = 44 }
  0x2c   : > { %1210 = dma.done.wait (%p1434_p8), [#allocation4], 9216   ;;  %p1435_p7 = pmov %p1434_p8 }
  0x2d   : > { %p257_p2 = scmp.lt.s32.totalorder %s1265_s24, 3  ;;  %vm281_vm0 = vcmask 261120   ;;  %v269_v6 = vld [vmem:[%s1423_s1] sm:$0xff]  ;;  %v444_v8 = vld [vmem:[#allocation3 + $0x8] sm:$0xff]  ;;  %v445_v13 = vld [vmem:[#allocation3 + $0x10] sm:$0xff]  ;;  %vm492_vm1 = vcmask 785408  }
  0x2e   : > { %1212 = vsyncadd (%p1435_p7), [#allocation4], 4294958080  ;;  %1023 = vmatprep.mubr.msk.f32.mxu0 %vm281_vm0, %v269_v6  ;;  %v446_v9 = vld [vmem:[#allocation3 + $0x18] sm:$0xff]  ;;  %v270_v10 = vld [vmem:[%s1423_s1 + $0x8] sm:$0xff]  ;;  %vm902_vm2 = vcmask 0  }
  0x2f   : > { %s1437_s24 = smov (!%p257_p2, %s1265_s24), 3  ;;  %v1073_v11 = vpack.c.bf16 %v446_v9, %v444_v8  ;;  %v443_v12 = vld [vmem:[#allocation3] sm:$0xff]  ;;  %v448_v14 = vld [vmem:[#allocation3 + $0x28] sm:$0xff]  ;;  %v450_v17 = vld [vmem:[#allocation3 + $0x38] sm:$0xff] }
  0x30   : > { %s998_s16 = sshll.u32 %s1437_s24, 5  ;;  %v271_v15 = vld [vmem:[%s1423_s1 + $0x10] sm:$0xff]  ;;  %v1075_v16 = vpack.c.bf16 %v445_v13, %v443_v12  ;;  %v447_v18 = vld [vmem:[#allocation3 + $0x20] sm:$0xff]  ;;  %v1077_v20 = vpack.c.bf16 %v450_v17, %v448_v14  ;;  %v471_v22 = vld [vmem:[#allocation3 + $0xd8] sm:$0xff] }
  0x31   : > { %s261_s19 = scalar_lea.vmem %s1422_s0, %s998_s16  ;;  %v449_v19 = vld [vmem:[#allocation3 + $0x30] sm:$0xff]  ;;  %1074 = vmatprep.subr.bf16.mxu1 %v1073_v11  ;;  %v469_v21 = vld [vmem:[#allocation3 + $0xc8] sm:$0xff]  ;;  %v454_v26 = vld [vmem:[#allocation3 + $0x58] sm:$0xff] }
  0x32   : > { %v265_v1 = vld [vmem:[%s261_s19] sm:$0xff]  ;;  %v266_v2 = vld [vmem:[%s261_s19 + $0x8] sm:$0xff]  ;;  %v267_v3 = vld [vmem:[%s261_s19 + $0x10] sm:$0xff]  ;;  %1076 = vmatpush1.bf16.msra.mxu1 %v1075_v16  ;;  %v1079_v24 = vpack.c.bf16 %v449_v19, %v447_v18  ;;  %v1049_v25 = vpack.c.bf16 %v471_v22, %v469_v21 }
  0x33   : > { %v1041_v4 = vpack.c.bf16 %v266_v2, %v265_v1  ;;  %v268_v5 = vld [vmem:[%s261_s19 + $0x18] sm:$0xff]  ;;  %v452_v23 = vld [vmem:[#allocation3 + $0x48] sm:$0xff]  ;;  %v468_v27 = vld [vmem:[#allocation3 + $0xc0] sm:$0xff]  ;;  %1078 = vmatprep.subr.bf16.mxu1 %v1077_v20  ;;  %s264_s19 = scalar_lea.vmem %s1428_s6, %s1437_s24 }
  0x34   : > { %v1045_v7 = vpack.c.bf16 %v268_v5, %v267_v3  ;;  %v470_v28 = vld [vmem:[#allocation3 + $0xd0] sm:$0xff]  ;;  %v1081_v29 = vpack.c.bf16 %v454_v26, %v452_v23  ;;  %v451_v31 = vld [vmem:[#allocation3 + $0x40] sm:$0xff]  ;;  %v473_v33 = vld [vmem:[#allocation3 + $0xe8] sm:$0xff] }
  0x35   : > { %1042 = vmatprep.subr.bf16.mxu0 %v1041_v4  ;;  %v1051_v30 = vpack.c.bf16 %v470_v28, %v468_v27  ;;  %v453_v32 = vld [vmem:[#allocation3 + $0x50] sm:$0xff]  ;;  %v475_v34 = vld [vmem:[#allocation3 + $0xf8] sm:$0xff]  ;;  %v456_v35 = vld [vmem:[#allocation3 + $0x68] sm:$0xff] }
  0x36   : > { %1044 = vmatpush3.bf16.msra.mxu0 %v1041_v4  ;;  %v458_v36 = vld [vmem:[#allocation3 + $0x78] sm:$0xff]  ;;  %v1053_v38 = vpack.c.bf16 %v475_v34, %v473_v33  ;;  %v472_v39 = vld [vmem:[#allocation3 + $0xe0] sm:$0xff]  ;;  %v474_v40 = vld [vmem:[#allocation3 + $0xf0] sm:$0xff]  ;;  %1080 = vmatpush1.bf16.msra.mxu1 %v1079_v24  ;;  %v1083_v42 = vpack.c.bf16 %v453_v32, %v451_v31  ;;  %v1220_v24 = vmov 0.0  }
  0x37   : > { %1046 = vmatprep.subr.bf16.mxu0 %v1045_v7  ;;  %v272_v37 = vld [vmem:[%s1423_s1 + $0x18] sm:$0xff]  ;;  %v273_v41 = vld [vmem:[%s1423_s1 + $0x20] sm:$0xff]  ;;  %v1055_v43 = vpack.c.bf16 %v474_v40, %v472_v39  ;;  %v477_v44 = vld [vmem:[#allocation3 + $0x108] sm:$0xff]  ;;  %1082 = vmatprep.subr.bf16.mxu1 %v1081_v29  ;;  %v1085_v46 = vpack.c.bf16 %v458_v36, %v456_v35 }
  0x38   : > { %v479_v45 = vld [vmem:[#allocation3 + $0x118] sm:$0xff]  ;;  %v455_v47 = vld [vmem:[#allocation3 + $0x60] sm:$0xff]  ;;  %v457_v48 = vld [vmem:[#allocation3 + $0x70] sm:$0xff]  ;;  %670 = vmatprep.mubr.f32.mxu1 %v1220_v24 }
  0x39   : > { %v1057_v49 = vpack.c.bf16 %v479_v45, %v477_v44  ;;  %v476_v50 = vld [vmem:[#allocation3 + $0x100] sm:$0xff]  ;;  %v460_v51 = vld [vmem:[#allocation3 + $0x88] sm:$0xff]  ;;  %v462_v52 = vld [vmem:[#allocation3 + $0x98] sm:$0xff]  ;;  %v1087_v59 = vpack.c.bf16 %v457_v48, %v455_v47 }
  0x3a   : > { %1048 = vmatpush3.bf16.msra.mxu0 %v1045_v7  ;;  %v478_v53 = vld [vmem:[#allocation3 + $0x110] sm:$0xff]  ;;  %v274_v54 = vld [vmem:[%s1423_s1 + $0x28] sm:$0xff]  ;;  %v483_v57 = vld [vmem:[#allocation3 + $0x138] sm:$0xff]  ;;  %1084 = vmatpush1.bf16.msra.mxu1 %v1083_v42  ;;  %v1089_v63 = vpack.c.bf16 %v462_v52, %v460_v51 }
  0x3b   : > { %1050 = vmatprep.subr.bf16.mxu0 %v1049_v25  ;;  %v1059_v55 = vpack.c.bf16 %v478_v53, %v476_v50  ;;  %v481_v56 = vld [vmem:[#allocation3 + $0x128] sm:$0xff]  ;;  %v480_v61 = vld [vmem:[#allocation3 + $0x120] sm:$0xff]  ;;  %v482_v62 = vld [vmem:[#allocation3 + $0x130] sm:$0xff]  ;;  %1086 = vmatprep.subr.bf16.mxu1 %v1085_v46 }
  0x3c   : > { %v275_v58 = vld [vmem:[%s1423_s1 + $0x30] sm:$0xff]  ;;  %v1061_v60 = vpack.c.bf16 %v483_v57, %v481_v56  ;;  %v459_v0 = vld [vmem:[#allocation3 + $0x80] sm:$0xff]  ;;  %v466_v3 = vld [vmem:[#allocation3 + $0xb8] sm:$0xff]  ;;  %v1063_v5 = vpack.c.bf16 %v482_v62, %v480_v61 }
  0x3d   : > { %1024 = vmatmul.mubr.msk.f32.vlgmr.msra.gmra.mrb[0].mxu0 %vm281_vm0, %v270_v10  ;;  %v461_v1 = vld [vmem:[#allocation3 + $0x90] sm:$0xff]  ;;  %v464_v2 = vld [vmem:[#allocation3 + $0xa8] sm:$0xff]  ;;  %v277_v6 = vld [vmem:[%s1423_s1 + $0x40] sm:$0xff] }
  0x3e   : > { %1026 = vmatprep.mubr.msk.f32.mxu0 %vm281_vm0, %v271_v15  ;;  %1052 = vmatpush1.bf16.msra.mxu0 %v1051_v30  ;;  %v276_v4 = vld [vmem:[%s1423_s1 + $0x38] sm:$0xff]  ;;  %v1091_v7 = vpack.c.bf16 %v461_v1, %v459_v0  ;;  %v1093_v8 = vpack.c.bf16 %v466_v3, %v464_v2  ;;  %v463_v9 = vld [vmem:[#allocation3 + $0xa0] sm:$0xff]  ;;  %v279_v12 = vld [vmem:[%s1423_s1 + $0x50] sm:$0xff] }
  0x3f   : > { %1054 = vmatprep.subr.bf16.mxu0 %v1053_v38  ;;  %1088 = vmatpush1.bf16.msra.mxu1 %v1087_v59  ;;  %v465_v10 = vld [vmem:[#allocation3 + $0xb0] sm:$0xff]  ;;  %v278_v11 = vld [vmem:[%s1423_s1 + $0x48] sm:$0xff]  ;;  %v487_v16 = vld [vmem:[#allocation3 + $0x158] sm:$0xff] }
  0x40   : > { %1090 = vmatprep.subr.bf16.mxu1 %v1089_v63  ;;  %v1095_v13 = vpack.c.bf16 %v465_v10, %v463_v9  ;;  %v280_v14 = vld [vmem:[%s1423_s1 + $0x58] sm:$0xff]  ;;  %v485_v15 = vld [vmem:[#allocation3 + $0x148] sm:$0xff]  ;;  %v484_v20 = vld [vmem:[#allocation3 + $0x140] sm:$0xff] }
  0x41   : > { %1027 = vmatmul.mubr.msk.f32.gmra.mrb[2].mxu0 %vm281_vm0, %v272_v37  ;;  %v697_v17 = vld [vmem:[#allocation3 + $0x188] sm:$0xff]  ;;  %v1065_v18 = vpack.c.bf16 %v487_v16, %v485_v15  ;;  %v699_v19 = vld [vmem:[#allocation3 + $0x198] sm:$0xff]  ;;  %v486_v21 = vld [vmem:[#allocation3 + $0x150] sm:$0xff] }
  0x42   : > { %1029 = vmatprep.mubr.msk.f32.mxu0 %vm281_vm0, %v273_v41  ;;  %1056 = vmatpush1.bf16.msra.mxu0 %v1055_v43  ;;  %v1097_v22 = vpack.c.bf16 %v699_v19, %v697_v17  ;;  %v1067_v23 = vpack.c.bf16 %v486_v21, %v484_v20  ;;  %v489_v25 = vld [vmem:[#allocation3 + $0x168] sm:$0xff]  ;;  %v491_v26 = vld [vmem:[#allocation3 + $0x178] sm:$0xff]  ;;  %v488_v28 = vld [vmem:[#allocation3 + $0x160] sm:$0xff] }
  0x43   : > { %1058 = vmatprep.subr.bf16.mxu0 %v1057_v49  ;;  %1092 = vmatpush1.bf16.msra.mxu1 %v1091_v7  ;;  %v1069_v27 = vpack.c.bf16 %v491_v26, %v489_v25  ;;  %v490_v29 = vld [vmem:[#allocation3 + $0x170] sm:$0xff]  ;;  %v696_v31 = vld [vmem:[#allocation3 + $0x180] sm:$0xff]  ;;  %v701_v33 = vld [vmem:[#allocation3 + $0x1a8] sm:$0xff] }
  0x44   : > { %1094 = vmatprep.subr.bf16.mxu1 %v1093_v8  ;;  %v1071_v30 = vpack.c.bf16 %v490_v29, %v488_v28  ;;  %v698_v32 = vld [vmem:[#allocation3 + $0x190] sm:$0xff]  ;;  %v703_v34 = vld [vmem:[#allocation3 + $0x1b8] sm:$0xff]  ;;  %v700_v38 = vld [vmem:[#allocation3 + $0x1a0] sm:$0xff] }
  0x45   : > { %1030 = vmatmul.mubr.msk.f32.gmra.mrb[4].mxu0 %vm281_vm0, %v274_v54  ;;  %v1099_v35 = vpack.c.bf16 %v698_v32, %v696_v31  ;;  %v1101_v37 = vpack.c.bf16 %v703_v34, %v701_v33  ;;  %v702_v39 = vld [vmem:[#allocation3 + $0x1b0] sm:$0xff]  ;;  %v705_v41 = vld [vmem:[#allocation3 + $0x1c8] sm:$0xff]  ;;  %v707_v42 = vld [vmem:[#allocation3 + $0x1d8] sm:$0xff] }
  0x46   : > { %1032 = vmatprep.mubr.msk.f32.mxu0 %vm281_vm0, %v275_v58  ;;  %1060 = vmatpush1.bf16.msra.mxu0 %v1059_v55  ;;  %v1103_v43 = vpack.c.bf16 %v702_v39, %v700_v38  ;;  %v1105_v45 = vpack.c.bf16 %v707_v42, %v705_v41  ;;  %v704_v46 = vld [vmem:[#allocation3 + $0x1c0] sm:$0xff]  ;;  %v706_v47 = vld [vmem:[#allocation3 + $0x1d0] sm:$0xff]  ;;  %v709_v49 = vld [vmem:[#allocation3 + $0x1e8] sm:$0xff] }
  0x47   : > { %1062 = vmatprep.subr.bf16.mxu0 %v1061_v60  ;;  %1096 = vmatpush1.bf16.msra.mxu1 %v1095_v13  ;;  %v711_v50 = vld [vmem:[#allocation3 + $0x1f8] sm:$0xff]  ;;  %v1107_v51 = vpack.c.bf16 %v706_v47, %v704_v46  ;;  %v708_v53 = vld [vmem:[#allocation3 + $0x1e0] sm:$0xff]  ;;  %v710_v54 = vld [vmem:[#allocation3 + $0x1f0] sm:$0xff] }
  0x48   : > { %1121 = vmatprep.subr.bf16.mxu1 %v1097_v22  ;;  %v1109_v56 = vpack.c.bf16 %v711_v50, %v709_v49  ;;  %v713_v57 = vld [vmem:[#allocation3 + $0x208] sm:$0xff]  ;;  %v715_v58 = vld [vmem:[#allocation3 + $0x218] sm:$0xff]  ;;  %v1111_v59 = vpack.c.bf16 %v710_v54, %v708_v53  ;;  %v712_v62 = vld [vmem:[#allocation3 + $0x200] sm:$0xff] }
  0x49   : > { %1033 = vmatmul.mubr.msk.f32.gmra.mrb[6].mxu0 %vm281_vm0, %v276_v4  ;;  %v1113_v61 = vpack.c.bf16 %v715_v58, %v713_v57  ;;  %v714_v63 = vld [vmem:[#allocation3 + $0x210] sm:$0xff]  ;;  %v717_v1 = vld [vmem:[#allocation3 + $0x228] sm:$0xff]  ;;  %v719_v2 = vld [vmem:[#allocation3 + $0x238] sm:$0xff] }
  0x4a   : > { %1035 = vmatprep.mubr.msk.f32.mxu0 %vm281_vm0, %v277_v6  ;;  %1064 = vmatpush1.bf16.msra.mxu0 %v1063_v5  ;;  %v1115_v3 = vpack.c.bf16 %v714_v63, %v712_v62  ;;  %v1117_v4 = vpack.c.bf16 %v719_v2, %v717_v1  ;;  %v716_v5 = vld [vmem:[#allocation3 + $0x220] sm:$0xff]  ;;  %v718_v6 = vld [vmem:[#allocation3 + $0x230] sm:$0xff] }
  0x4b   : > { %1066 = vmatprep.subr.bf16.mxu0 %v1065_v18  ;;  %v1119_v9 = vpack.c.bf16 %v718_v6, %v716_v5  ;;  %v829_v31 = vld [vmem:[%s1425_s3] sm:$0x3]  ;;  %v860_v58 = vld [vmem:[%s1426_s4 + $0x18] sm:$0xff]  ;;  %v862_v5 = vld [vmem:[%s1426_s4 + $0x28] sm:$0xff] }
  0x4d   : > { %1036 = vmatmul.mubr.msk.f32.gmra.mrb[8].mxu0 %vm281_vm0, %v278_v11 }
  0x4e   : > { %1038 = vmatprep.mubr.msk.f32.mxu0 %vm281_vm0, %v279_v12  ;;  %1068 = vmatpush1.bf16.msra.mxu0 %v1067_v23 }
  0x4f   : > { %1070 = vmatprep.subr.bf16.mxu0 %v1069_v27 }
  0x51   : > { %1039 = vmatmul.mubr.msk.f32.gmra.mrb[10].mxu0 %vm281_vm0, %v280_v14 }
  0x52   : > { %569 = vmatprep.mubr.f32.mxu0 %v1220_v24  ;;  %1072 = vmatpush1.bf16.msra.mxu0 %v1071_v30 }
  0x53   : > { %1098 = vmatprep.subr.bf16.mxu0 %v1097_v22  ;;  %v831_v22 = vlaneseq }
  0x55   : > { %v832_v26 = vshrl.u32 %v831_v22, 7 }
  0x57   : > { %v837_v30 = vsub.s32 1, %v832_v26  ;;  %v833_v32 = vsub.s32 0, %v832_v26 }
  0x59   : > { %v834_v38 = vrot.slane %v829_v31, %v833_v32 }
 0x110   : > { %v1025_v36 = vpop.f32.mrb[0].mxu0 }
 0x111   : > { %v384_v40 = vpop.f32.mrb[1].mxu0 }
 0x112   : > { %988 = vmatmul.mubr.msk.f32.vlgmr.msra.gmra.mrb[0].mxu1 %vm492_vm1, %v384_v40 }
 0x113   : > { %1127 = vmatpush1.bf16.msra.mxu1 %v1099_v35  ;;  %676 = vmatprep.mubr.f32.mxu1 %v1220_v24 }
 0x114   : > { %v1028_v44 = vpop.f32.mrb[2].mxu0  ;;  %1122 = vmatprep.subr.bf16.mxu1 %v1101_v37 }
 0x115   : > { %v394_v48 = vpop.f32.mrb[3].mxu0 }
 0x116   : > { %989 = vmatmul.mubr.msk.f32.gmra.mrb[2].mxu1 %vm492_vm1, %v1025_v36  ;;  %v838_v36 = vrot.slane %v829_v31, %v837_v30 }
 0x117   : > { %1128 = vmatpush1.bf16.msra.mxu1 %v1103_v43  ;;  %682 = vmatprep.mubr.f32.mxu1 %v1220_v24 }
 0x118   : > { %v1031_v52 = vpop.f32.mrb[4].mxu0  ;;  %1123 = vmatprep.subr.bf16.mxu1 %v1105_v45 }
 0x119   : > { %v404_v55 = vpop.f32.mrb[5].mxu0 }
 0x11a   : > { %984 = vmatmul.mubr.msk.f32.vlgmr.msra.gmra.mrb[12].mxu0 %vm492_vm1, %v404_v55  ;;  %990 = vmatmul.mubr.msk.f32.gmra.mrb[4].mxu1 %vm492_vm1, %v394_v48  ;;  %v857_v55 = vld [vmem:[%s1426_s4] sm:$0xff] }
 0x11b   : > { %1100 = vmatpush1.bf16.msra.mxu0 %v1099_v35  ;;  %1129 = vmatpush1.bf16.msra.mxu1 %v1107_v51 }
 0x11c   : > { %575 = vmatprep.mubr.f32.mxu0 %v1220_v24  ;;  %688 = vmatprep.mubr.f32.mxu1 %v1220_v24  ;;  %v1034_v60 = vpop.f32.mrb[6].mxu0 }
 0x11d   : > { %1102 = vmatprep.subr.bf16.mxu0 %v1101_v37  ;;  %1124 = vmatprep.subr.bf16.mxu1 %v1109_v56  ;;  %v414_v0 = vpop.f32.mrb[7].mxu0 }
 0x11e   : > { %985 = vmatmul.mubr.msk.f32.gmra.mrb[14].mxu0 %vm492_vm1, %v1031_v52  ;;  %991 = vmatmul.mubr.msk.f32.gmra.mrb[6].mxu1 %vm492_vm1, %v1028_v44  ;;  %v858_v52 = vld [vmem:[%s1426_s4 + $0x8] sm:$0xff] }
 0x11f   : > { %1104 = vmatpush1.bf16.msra.mxu0 %v1103_v43  ;;  %1130 = vmatpush1.bf16.msra.mxu1 %v1111_v59 }
 0x120   : > { %1106 = vmatprep.subr.bf16.mxu0 %v1105_v45  ;;  %1125 = vmatprep.subr.bf16.mxu1 %v1113_v61  ;;  %v1037_v7 = vpop.f32.mrb[8].mxu0 }
 0x121   : > { %581 = vmatprep.mubr.f32.mxu0 %v1220_v24  ;;  %802 = vmatprep.mubr.f32.mxu1 %v1220_v24  ;;  %v424_v8 = vpop.f32.mrb[9].mxu0 }
 0x122   : > { %986 = vmatmul.mubr.msk.f32.gmra.mrb[16].mxu0 %vm492_vm1, %v414_v0 }
 0x123   : > { %1108 = vmatpush1.bf16.msra.mxu0 %v1107_v51  ;;  %1131 = vmatpush1.bf16.msra.mxu1 %v1115_v3 }
 0x124   : > { %1110 = vmatprep.subr.bf16.mxu0 %v1109_v56  ;;  %1126 = vmatprep.subr.bf16.mxu1 %v1117_v4  ;;  %v1040_v10 = vpop.f32.mrb[10].mxu0 }
 0x125   : > { %587 = vmatprep.mubr.f32.mxu0 %v1220_v24  ;;  %v434_v11 = vpop.f32.mrb[11].mxu0 }
 0x126   : > { %987 = vmatmul.mubr.msk.f32.gmra.mrb[18].mxu0 %vm492_vm1, %v1034_v60  ;;  %v859_v60 = vld [vmem:[%s1426_s4 + $0x10] sm:$0xff] }
 0x127   : > { %1112 = vmatpush1.bf16.msra.mxu0 %v1111_v59  ;;  %1132 = vmatpush1.bf16.msra.mxu1 %v1119_v9 }
 0x128   : > { %1114 = vmatprep.subr.bf16.mxu0 %v1113_v61  ;;  %796 = vmatprep.mubr.f32.mxu0 %v1220_v24 }
 0x12a   : > { %993 = vmatmul.mubr.msk.f32.vlgmr.msra.gmra.mrb[2].mxu1 %vm492_vm1, %v1037_v7 }
 0x12b   : > { %1116 = vmatpush1.bf16.msra.mxu0 %v1115_v3  ;;  %808 = vmatprep.mubr.f32.mxu1 %v1220_v24 }
 0x12c   : > { %1118 = vmatprep.subr.bf16.mxu0 %v1117_v4 }
 0x12e   : > { %994 = vmatmul.mubr.msk.f32.gmra.mrb[4].mxu1 %vm492_vm1, %v434_v11 }
 0x12f   : > { %1120 = vmatpush1.bf16.msra.mxu0 %v1119_v9  ;;  %814 = vmatprep.mubr.f32.mxu1 %v1220_v24 }
 0x132   : > { %992 = vmatmul.mubr.msk.f32.vlgmr.msra.gmra.mrb[20].mxu0 %vm492_vm1, %v424_v8  ;;  %995 = vmatmul.mubr.msk.f32.gmra.mrb[6].mxu1 %vm492_vm1, %v1040_v10  ;;  %v861_v8 = vld [vmem:[%s1426_s4 + $0x20] sm:$0xff] }
 0x1e5   : > { %v672_v12 = vpop.f32.mrb[0].mxu1 }
 0x1e6   : > { %v674_v13 = vpop.f32.mrb[1].mxu1 }
 0x1ed   : > { %v571_v14 = vpop.f32.mrb[12].mxu0 }
 0x1ee   : > { %v673_v15 = vadd.f32 %v672_v12, %v571_v14  ;;  %v573_v16 = vpop.f32.mrb[13].mxu0 }
 0x1ef   : > { %v675_v17 = vadd.f32 %v674_v13, %v573_v16 }
 0x1f1   : > { %v577_v18 = vpop.f32.mrb[14].mxu0 }
 0x1f2   : > { %v579_v19 = vpop.f32.mrb[15].mxu0 }
 0x1f5   : > { %v583_v20 = vpop.f32.mrb[16].mxu0 }
 0x1f6   : > { %v585_v21 = vpop.f32.mrb[17].mxu0 }
 0x1f9   : > { %v589_v23 = vpop.f32.mrb[18].mxu0 }
 0x1fa   : > { %v591_v25 = vpop.f32.mrb[19].mxu0 }
 0x1fd   : > { %v804_v27 = vpop.f32.mrb[2].mxu1 }
 0x1fe   : > { %v1137_v24 = vadd.f32 %v804_v27, %v577_v18  ;;  %v806_v28 = vpop.f32.mrb[3].mxu1 }
 0x1ff   : > { %v1138_v29 = vadd.f32 %v806_v28, %v579_v19 }
 0x200   : > { %v843_v48 = vadd.f32 %v1137_v24, %v834_v38 }
 0x201   : > { %v810_v33 = vpop.f32.mrb[4].mxu1  ;;  %v844_v45 = vadd.f32 %v1138_v29, %v838_v36 }
 0x202   : > { %v1139_v34 = vadd.f32 %v810_v33, %v583_v20  ;;  %v812_v35 = vpop.f32.mrb[5].mxu1  ;;  %v851_v57 = vmax.f32 %v843_v48, 0.0  ;;  %v894_v33 = vld [vmem:[#allocation2] sm:$0x1] }
 0x203   : > { %v1140_v37 = vadd.f32 %v812_v35, %v585_v21  ;;  %v852_v53 = vmax.f32 %v844_v45, 0.0 }
 0x204   : > { %v845_v59 = vadd.f32 %v1139_v34, %v834_v38  ;;  %v867_v3 = vmul.f32 %v859_v60, %v851_v57 }
 0x205   : > { %v798_v39 = vpop.f32.mrb[20].mxu0  ;;  %v816_v40 = vpop.f32.mrb[6].mxu1  ;;  %v846_v54 = vadd.f32 %v1140_v37, %v838_v36  ;;  %v868_v63 = vmul.f32 %v860_v58, %v852_v53 }
 0x206   : > { %v821_v41 = vadd.f32 %v798_v39, %v673_v15  ;;  %v1141_v42 = vadd.f32 %v816_v40, %v589_v23  ;;  %v800_v43 = vpop.f32.mrb[21].mxu0  ;;  %v818_v44 = vpop.f32.mrb[7].mxu1  ;;  %v853_v4 = vmax.f32 %v845_v59, 0.0  ;;  %v864_v15 = vld [vmem:[%s1426_s4 + $0x38] sm:$0xff] }
 0x207   : > { %v822_v46 = vadd.f32 %v800_v43, %v675_v17  ;;  %v1142_v47 = vadd.f32 %v818_v44, %v591_v25  ;;  %v854_v0 = vmax.f32 %v846_v54, 0.0  ;;  %v876_v10 = vsel %vm492_vm1, %v868_v63, 0.0  ;;  %v863_v17 = vld [vmem:[%s1426_s4 + $0x30] sm:$0xff] }
 0x208   : > { %v841_v49 = vadd.f32 %v834_v38, %v821_v41  ;;  %v847_v6 = vadd.f32 %v1141_v42, %v834_v38  ;;  %v869_v13 = vmul.f32 %v861_v8, %v853_v4 }
 0x209   : > { %v842_v50 = vadd.f32 %v838_v36, %v822_v46  ;;  %v848_v2 = vadd.f32 %v1142_v47, %v838_v36  ;;  %v870_v11 = vmul.f32 %v862_v5, %v854_v0 }
 0x20a   : > { %v849_v51 = vmax.f32 %v841_v49, 0.0  ;;  %v855_v14 = vmax.f32 %v847_v6, 0.0 }
 0x20b   : > { %v850_v56 = vmax.f32 %v842_v50, 0.0  ;;  %v856_v12 = vmax.f32 %v848_v2, 0.0  ;;  %v879_v20 = vsel %vm492_vm1, %v870_v11, 0.0 }
 0x20c   : > { %v865_v62 = vmul.f32 %v857_v55, %v849_v51  ;;  %v871_v21 = vmul.f32 %v863_v17, %v855_v14 }
 0x20d   : > { %v866_v61 = vmul.f32 %v858_v52, %v850_v56  ;;  %v872_v19 = vmul.f32 %v864_v15, %v856_v12 }
 0x20f   : > { %v873_v1 = vsel %vm492_vm1, %v866_v61, 0.0  ;;  %v882_v25 = vsel %vm492_vm1, %v872_v19, 0.0 }
 0x210   : > { %v874_v7 = vadd.f32 %v873_v1, %v865_v62 }
 0x212   : > { %v875_v9 = vadd.f32 %v874_v7, %v867_v3 }
 0x214   : > { %v877_v16 = vadd.f32 %v876_v10, %v875_v9 }
 0x216   : > { %v878_v18 = vadd.f32 %v877_v16, %v869_v13 }
 0x218   : > { %v880_v22 = vadd.f32 %v879_v20, %v878_v18 }
 0x21a   : > { %v881_v23 = vadd.f32 %v880_v22, %v871_v21 }
 0x21c   : > { %v883_v26 = vadd.f32 %v882_v25, %v881_v23 }
 0x21e   : > { %884 = vadd.xlane.f32.xlu0 %v883_v26 }
 0x2ab   : > { %v885_v27 = vpop.xlane.xlu0 %884 }
 0x2ac   : > { %v886_v24 = vrot.slane %v885_v27, 4 }
 0x2ae   : > { %v887_v28 = vadd.f32 %v886_v24, %v885_v27 }
 0x2b0   : > { %v888_v29 = vrot.slane %v887_v28, 2 }
 0x2b2   : > { %v889_v30 = vadd.f32 %v888_v29, %v887_v28 }
 0x2b4   : > { %v890_v31 = vrot.slane %v889_v30, 1 }
 0x2b6   : > { %v891_v32 = vadd.f32 %v890_v31, %v889_v30 }
 0x2b8   : > { %1149 = vpush %v891_v32 }
 0x2e9   : > { %s1150_s16 = spop %1149 }
 0x2ea   : > { %v893_v34 = vstv %s1150_s16 }
 0x2eb   : > { %v895_v35 = vadd.f32 %v894_v33, %v893_v34 }
 0x2ed   : > { %v896_v36 = vsub.f32 0.0, %v895_v35 }
 0x2ef   : > { %v897_v37 = vmul.f32 1.442695, %v896_v36 }
 0x2f1   : > { %1173 = vpow2.f32 %v897_v37 }
 0x2fb   : > { %v1174_v38 = vpop.eup %1173 }
 0x2fc   : > { %v899_v39 = vadd.f32 1.0, %v1174_v38 }
 0x2fe   : > { %1175 = vrcp.f32 %v899_v39 }
 0x308   : > { %v1176_v40 = vpop.eup %1175 }
 0x309   : > { %903 = vst.msk [vmem:[%s264_s19] sm:$0x1] %vm902_vm2, %v1176_v40 }
 0x30a PF: > { %s19_s23 = sadd.s32 1, %s1215_s23  }
 0x30b   : > { %p16_p3 = scmp.ge.s32.totalorder %s19_s23, 6  }
 0x30d   :  { %18 = sbr.rel (!%p16_p3) target bundleno = 4 (0x4), region = 81 }
 0x314   :  { %921 = vsyncpa [#allocation4], 1 }
 0x315   :  { %923 = vsyncpa [#allocation4 + $0x1], 1 }

</bundles_post_ra>
